<compile_context>
chip_gen: v6e
topology: v6e:2x2x1
jax: 0.10.0
libtpu: 0.0.40
codegen_flags: <defaults>
</compile_context>

<pallas_src>
import functools

import jax
import jax.numpy as jnp
from jax.experimental import pallas as pl
from jax.experimental.pallas import tpu as pltpu


def _downsample_kernel(x_ref, w_ref, b_ref, o_ref, *, oh):
    """One (batch, width-tile) block.

    x_ref: (P, T_OW, 8C)   width-folded space-to-depth input, P = oh + 1
    w_ref: (2, 8C, OCp)    packed conv weights, tap index = dp
    b_ref: (1, OCp)        f32 bias (lane-padded)
    o_ref: (oh, T_OW, OCp) output block
    """
    t_ow = x_ref.shape[1]
    k = x_ref.shape[2]
    ocp = o_ref.shape[-1]
    m = oh * t_ow

    # dp-tap slices are plane (major-axis) slices: the dp=1 start offset is
    # T_OW sublanes (a multiple of 8), so the reshape to (M, 8C) is a relabel.
    x0 = x_ref[0:oh].reshape(m, k)          # dp = 0 tap
    x1 = x_ref[1:oh + 1].reshape(m, k)      # dp = 1 tap

    acc = jnp.dot(x0, w_ref[0], preferred_element_type=jnp.float32)
    acc = acc + jnp.dot(x1, w_ref[1], preferred_element_type=jnp.float32)
    acc = acc + b_ref[...]                   # (1, OCp) f32 broadcast
    o_ref[...] = acc.reshape(oh, t_ow, ocp).astype(o_ref.dtype)


def _choose_t_ow(ow, col_bytes, budget=4 << 20):
    """Largest multiple-of-8 divisor of OW whose (P, T_OW, 8C) input block fits
    within ~`budget` bytes.  Falls back to the full width if OW % 8 != 0."""
    if ow % 8 != 0:
        return ow
    best = 8
    for cand in range(8, ow + 1, 8):
        if ow % cand == 0 and cand * col_bytes <= budget:
            best = max(best, cand)
    return best


def downsample(x, weight, bias, img_size=(128, 128), *,
               compute_dtype=jnp.bfloat16):
    """Pallas port of ShadowMamba `Downsample.forward`.

    x      : (B, L, C_in) with L = H*W
    weight : (C_out, C_in, 4, 4)  (PyTorch OIHW conv weight)
    bias   : (C_out,)
    returns: (B, (H//2)*(W//2), C_out) in x.dtype
    """
    B, L, C = x.shape
    H, W = img_size
    assert L == H * W, "token count must equal H*W"
    assert H % 2 == 0 and W % 2 == 0, "spatial dims must be even"
    OC = weight.shape[0]
    assert weight.shape == (OC, C, 4, 4) and bias.shape == (OC,)

    OH, OW = H // 2, W // 2
    P = OH + 1
    C8 = 8 * C
    OCp = ((OC + 127) // 128) * 128           # lane-dense output channels

    # ---- wrapper repack (done in compute_dtype to halve repack HBM bytes) ----
    xc = x.astype(compute_dtype).reshape(B, H, W, C)
    x_pad = jnp.pad(xc, ((0, 0), (1, 1), (1, 1), (0, 0)))
    # space-to-depth by 2: channel index inside a 2x2 cell is r*2C + s*C + c
    x_s2d = (x_pad.reshape(B, P, 2, OW + 1, 2, C)
                  .transpose(0, 1, 3, 2, 4, 5)
                  .reshape(B, P, OW + 1, 4 * C))
    # width fold: concat the two dq phases along channels -> (B, P, OW, 8C);
    # packed channel index = dq*4C + r*2C + s*C + c
    x_wf = jnp.concatenate([x_s2d[:, :, :OW, :], x_s2d[:, :, 1:, :]], axis=-1)

    # OIHW weight -> (dp, [dq, r, s, c], OC): kh = 2*dp + r, kw = 2*dq + s
    w = weight.reshape(OC, C, 2, 2, 2, 2).transpose(2, 4, 3, 5, 1, 0)
    w2 = w.reshape(2, C8, OC).astype(compute_dtype)
    b2 = bias.astype(jnp.float32)
    if OCp != OC:
        w2 = jnp.pad(w2, ((0, 0), (0, 0), (0, OCp - OC)))
        b2 = jnp.pad(b2, (0, OCp - OC))
    b2 = b2.reshape(1, OCp)

    itemsize = jnp.dtype(compute_dtype).itemsize
    t_ow = _choose_t_ow(OW, P * C8 * itemsize)
    n_w = OW // t_ow

    kernel = functools.partial(_downsample_kernel, oh=OH)

    out = pl.pallas_call(
        kernel,
        out_shape=jax.ShapeDtypeStruct((B, OH, OW, OCp), x.dtype),
        grid_spec=pltpu.PrefetchScalarGridSpec(
            num_scalar_prefetch=0,
            grid=(B, n_w),
            in_specs=[
                # Width-tiled input block: ~1-4 MiB, no halo needed along OW
                # because the width shift is folded into channels.
                pl.BlockSpec((None, P, t_ow, C8), lambda b, j: (b, 0, j, 0)),
                # Constant index maps -> weights / bias fetched once, reused.
                pl.BlockSpec((2, C8, OCp), lambda b, j: (0, 0, 0)),
                pl.BlockSpec((1, OCp), lambda b, j: (0, 0)),
            ],
            out_specs=pl.BlockSpec((None, OH, t_ow, OCp),
                                   lambda b, j: (b, 0, j, 0)),
        ),
        compiler_params=pltpu.CompilerParams(
            # batch and width tiles are independent -> megacore sharding on v7x
            dimension_semantics=("parallel", "parallel"),
            vmem_limit_bytes=48 * 1024 * 1024,   # headroom under v7x's 64 MiB
        ),
    )(x_wf, w2, b2)

    out = out.reshape(B, OH * OW, OCp)
    if OCp != OC:
        out = out[..., :OC]
    return out


def _reference(x, weight, bias, img_size):
    """Pure-JAX reference matching PyTorch Downsample.forward semantics."""
    B, L, C = x.shape
    H, W = img_size
    x_nchw = jnp.transpose(x, (0, 2, 1)).reshape(B, C, H, W)
    out = jax.lax.conv_general_dilated(
        x_nchw, weight, window_strides=(2, 2), padding=((1, 1), (1, 1)),
        dimension_numbers=("NCHW", "OIHW", "NCHW"),
        precision=jax.lax.Precision.HIGHEST)
    out = out + bias.reshape(1, -1, 1, 1)
    OC = weight.shape[0]
    return out.reshape(B, OC, -1).transpose(0, 2, 1)


if __name__ == "__main__":
    key = jax.random.PRNGKey(0)
    k_x, k_w, k_b = jax.random.split(key, 3)

    B, C_in, C_out = 2, 4, 8
    H = W = 16
    L = H * W

    x = jax.random.normal(k_x, (B, L, C_in), dtype=jnp.float32)
    weight = 0.1 * jax.random.normal(k_w, (C_out, C_in, 4, 4), dtype=jnp.float32)
    bias = 0.1 * jax.random.normal(k_b, (C_out,), dtype=jnp.float32)

    out = downsample(x, weight, bias, img_size=(H, W))
    out = jax.block_until_ready(out)

    ref = _reference(x, weight, bias, (H, W))
    assert out.shape == (B, (H // 2) * (W // 2), C_out), out.shape
    # bf16 operands (f32 accumulation) -> loose tolerance vs. f32 HIGHEST ref.
    assert jnp.allclose(out, ref, atol=2e-2, rtol=2e-2), \
        float(jnp.max(jnp.abs(out - ref)))

    print("KERNEL_OK")
</pallas_src>

<mosaic_0001>
module attributes {stable_mosaic.version = 11 : i64} {
  func.func @_downsample_kernel(%arg0: i32, %arg1: i32, %arg2: memref<1x9x8x32xbf16, #tpu.memory_space<vmem>>, %arg3: memref<2x32x128xbf16, #tpu.memory_space<vmem>>, %arg4: memref<1x128xf32, #tpu.memory_space<vmem>>, %arg5: memref<1x8x8x128xf32, #tpu.memory_space<vmem>>) attributes {dimension_semantics = [#tpu.dimension_semantics<parallel>, #tpu.dimension_semantics<parallel>], iteration_bounds = array<i64: 2, 1>, scalar_prefetch = 0 : i64, scratch_operands = 0 : i64, tpu.core_type = #tpu.core_type<tc>, window_params = [{transform_indices = @transform_0, window_bounds = array<i64: 1, 9, 8, 32>}, {pipeline_mode = #tpu.pipeline_mode<synchronous>, transform_indices = @transform_1, window_bounds = array<i64: 2, 32, 128>}, {pipeline_mode = #tpu.pipeline_mode<synchronous>, transform_indices = @transform_2, window_bounds = array<i64: 1, 128>}, {transform_indices = @transform_3, window_bounds = array<i64: 1, 8, 8, 128>}]} {
    %c0 = arith.constant 0 : index
    %c0_0 = arith.constant 0 : index
    %c0_1 = arith.constant 0 : index
    %c0_2 = arith.constant 0 : index
    %0 = vector.load %arg2[%c0, %c0_0, %c0_1, %c0_2] : memref<1x9x8x32xbf16, #tpu.memory_space<vmem>>, vector<1x8x8x32xbf16>
    %1 = vector.shape_cast %0 : vector<1x8x8x32xbf16> to vector<8x8x32xbf16>
    %2 = vector.shape_cast %1 : vector<8x8x32xbf16> to vector<64x32xbf16>
    %c0_3 = arith.constant 0 : index
    %c1 = arith.constant 1 : index
    %c0_4 = arith.constant 0 : index
    %c0_5 = arith.constant 0 : index
    %3 = vector.load %arg2[%c0_3, %c1, %c0_4, %c0_5] : memref<1x9x8x32xbf16, #tpu.memory_space<vmem>>, vector<1x8x8x32xbf16>
    %4 = vector.shape_cast %3 : vector<1x8x8x32xbf16> to vector<8x8x32xbf16>
    %5 = vector.shape_cast %4 : vector<8x8x32xbf16> to vector<64x32xbf16>
    %c0_6 = arith.constant 0 : index
    %c0_7 = arith.constant 0 : index
    %c0_8 = arith.constant 0 : index
    %6 = vector.load %arg3[%c0_6, %c0_7, %c0_8] : memref<2x32x128xbf16, #tpu.memory_space<vmem>>, vector<1x32x128xbf16>
    %7 = vector.shape_cast %6 : vector<1x32x128xbf16> to vector<32x128xbf16>
    %cst = arith.constant dense<0.000000e+00> : vector<64x128xf32>
    %8 = tpu.matmul %2, %7, %cst {dimension_numbers = #tpu.dot_dimension_numbers<[1], [0], [0], [1], [0, 0, 1, 1], [], []>} : vector<64x32xbf16>, vector<32x128xbf16>, vector<64x128xf32> -> vector<64x128xf32>
    %c1_9 = arith.constant 1 : index
    %c0_10 = arith.constant 0 : index
    %c0_11 = arith.constant 0 : index
    %9 = vector.load %arg3[%c1_9, %c0_10, %c0_11] : memref<2x32x128xbf16, #tpu.memory_space<vmem>>, vector<1x32x128xbf16>
    %10 = vector.shape_cast %9 : vector<1x32x128xbf16> to vector<32x128xbf16>
    %cst_12 = arith.constant dense<0.000000e+00> : vector<64x128xf32>
    %11 = tpu.matmul %5, %10, %cst_12 {dimension_numbers = #tpu.dot_dimension_numbers<[1], [0], [0], [1], [0, 0, 1, 1], [], []>} : vector<64x32xbf16>, vector<32x128xbf16>, vector<64x128xf32> -> vector<64x128xf32>
    %12 = arith.addf %8, %11 : vector<64x128xf32>
    %c0_13 = arith.constant 0 : index
    %c0_14 = arith.constant 0 : index
    %13 = vector.load %arg4[%c0_13, %c0_14] : memref<1x128xf32, #tpu.memory_space<vmem>>, vector<1x128xf32>
    %14 = vector.broadcast %13 : vector<1x128xf32> to vector<64x128xf32>
    %15 = arith.addf %12, %14 : vector<64x128xf32>
    %16 = vector.shape_cast %15 : vector<64x128xf32> to vector<8x8x128xf32>
    %c0_15 = arith.constant 0 : index
    %c0_16 = arith.constant 0 : index
    %c0_17 = arith.constant 0 : index
    %c0_18 = arith.constant 0 : index
    %17 = vector.load %arg5[%c0_15, %c0_16, %c0_17, %c0_18] : memref<1x8x8x128xf32, #tpu.memory_space<vmem>>, vector<1x8x8x128xf32>
    %18 = vector.shape_cast %17 : vector<1x8x8x128xf32> to vector<8x8x128xf32>
    %19 = vector.shape_cast %16 : vector<8x8x128xf32> to vector<1x8x8x128xf32>
    tpu.vector_store %arg5[%c0_15, %c0_16, %c0_17, %c0_18], %19 {strides = array<i32>} : memref<1x8x8x128xf32, #tpu.memory_space<vmem>>, vector<1x8x8x128xf32>,
    return
  }
  func.func @transform_0(%arg0: i32, %arg1: i32) -> (i32, i32, i32, i32) {
    %c0_i32 = arith.constant 0 : i32
    %c0_i32_0 = arith.constant 0 : i32
    %c0_i32_1 = arith.constant 0 : i32
    return %arg0, %c0_i32, %arg1, %c0_i32_0 : i32, i32, i32, i32
  }
  func.func @transform_1(%arg0: i32, %arg1: i32) -> (i32, i32, i32) {
    %c0_i32 = arith.constant 0 : i32
    %c0_i32_0 = arith.constant 0 : i32
    %c0_i32_1 = arith.constant 0 : i32
    %c0_i32_2 = arith.constant 0 : i32
    return %c0_i32, %c0_i32_0, %c0_i32_1 : i32, i32, i32
  }
  func.func @transform_2(%arg0: i32, %arg1: i32) -> (i32, i32) {
    %c0_i32 = arith.constant 0 : i32
    %c0_i32_0 = arith.constant 0 : i32
    %c0_i32_1 = arith.constant 0 : i32
    return %c0_i32, %c0_i32_0 : i32, i32
  }
  func.func @transform_3(%arg0: i32, %arg1: i32) -> (i32, i32, i32, i32) {
    %c0_i32 = arith.constant 0 : i32
    %c0_i32_0 = arith.constant 0 : i32
    %c0_i32_1 = arith.constant 0 : i32
    return %arg0, %c0_i32, %arg1, %c0_i32_0 : i32, i32, i32, i32
  }
}

</mosaic_0001>

<bundles_post_ra>
// kernel: tpu_custom_call.1
= control target key start
LH: loop header
LB: loop body
LE: loop exit
PB: predicated region body
PF: predicated region fallthrough
CT: control target
= control target key end

     0   :  { %8 = vsyncpa [#allocation3], 0  ;;  %s1153_s0 = inlined_call_operand.hbm [shape: bf16[2,9,8,32], index: 0, kind: input, shape index: {}]   ;;  %s1154_s1 = inlined_call_operand.hbm [shape: bf16[2,32,128], index: 1, kind: input, shape index: {}]   ;;  %s1155_s2 = inlined_call_operand.vmem [shape: f32[1,128], index: 2, kind: input, shape index: {}]   ;;  %s1156_s3 = inlined_call_operand.hbm [shape: f32[2,8,8,128], index: 3, kind: output, shape index: {}]  }
   0x1   :  { %10 = vsyncpa [#allocation3 + $0x1], 0 }
   0x2   :  { %11 = vsyncpa [#allocation6], 0 }
   0x3   :  { %12 = vsyncpa [#allocation4], 0 }
   0x4   :  { %14 = vsyncpa [#allocation4 + $0x1], 0  ;;  %s939_s12 = smov 0   ;;  %s941_s13 = smov 0  }
   0x5   :  { %s943_s14 = smov 0   ;;  %s945_s15 = smov 0  }
   0x6   :  { %s947_s16 = smov 0   ;;  %s949_s17 = smov 0  }
   0x7 LB: > { %s600_s18 = sadd.s32 4294967295, %s910_s17   ;;  %s601_s19 = sadd.s32 4294967294, %s910_s17   ;;  %s910_s17 = sphi %s949_s17, %s20_s17   ;;  %s906_s16 = sphi %s947_s16, %s1172_s16   ;;  %s902_s15 = sphi %s945_s15, %s1171_s15   ;;  %s898_s14 = sphi %s943_s14, %s1170_s14   ;;  %s894_s13 = sphi %s941_s13, %s1169_s13   ;;  %s890_s12 = sphi %s939_s12, %s1168_s12  }
   0x8   : > { %p54_p0 = scmp.ne.s32.totalorder %s894_s13, %s890_s12  ;;  %p973_p1 = scmp.eq.s32.totalorder %s600_s18, 0 }
   0x9   : > { %p977_p2 = scmp.eq.s32.totalorder %s600_s18, 1  ;;  %p128_p3 = scmp.eq.s32.totalorder %s601_s19, 1 }
   0xa   : > { %p983_p4 = por %p973_p1, %p54_p0  ;;  %p602_p5 = scmp.ge.s32.totalorder %s910_s17, 1 }
   0xb   : > { %p988_p6 = por %p128_p3, %p54_p0  ;;  %p135_p7 = scmp.lt.s32.totalorder %s910_s17, 3 }
   0xc   : > { %s1160_s22 = scalar_select %p983_p4, 1, 0 }
   0xd   : > { %s1161_s23 = scalar_select %p988_p6, 1, 0 }
   0xe   : > { %p993_p8 = pnand %p602_p5, %p135_p7  ;;  %s912_s25 = smov [#allocation5]  }
   0xf   : > { %s147_s26 = sshll.u32 %s912_s25, 4  ;;  %p604_p10 = scmp.ge.s32.totalorder %s910_s17, 2  ;;  %s148_s26 = int_to_ptr.vmem [resolvable:$true] %s147_s26 }
  0x10   : > { %p691_p9 = pneg %p993_p8  ;;  %s32_s28 = sadd.s32 1, %s906_s16 }
  0x11   : > { %s783_s29 = scalar_lea.vmem %s148_s26, 512  ;;  %p791_p5 = scmp.lt.s32.totalorder %s148_s26, %s148_s26 }
  0x12   : > { %p1002_p11 = pnand %p691_p9, %p973_p1  ;;  %p784_p13 = scmp.ne.s32.totalorder %s148_s26, %s783_s29 }
  0x13   : > { %p792_p7 = scmp.lt.s32.totalorder %s783_s29, %s783_s29 }
  0x14   : > { %p774_p12 = pneg %p1002_p11 }
  0x15   : > { %p793_p6 = por %p792_p7, %p791_p5 }
  0x16   : > { %p786_p0 = pnand %p784_p13, %p774_p12 }
  0x18   : > { %p787_p3 = pneg %p786_p0 }
  0x1a   : > { %p794_p4 = pnand %p793_p6, %p787_p3 }
  0x1c   : > { %797 = shalt.err (!%p794_p4)
}
  0x1d   : > { %s913_s30 = smov 64   ;;  %s914_s4 = smov 4  }
  0x1e   : > { %694 = dma.hbm_to_vmem [thread:$0]  (!%p1002_p11), %s1154_s1, 512, %s148_s26, [#allocation6], %s913_s30, %s913_s30, %s914_s4  }
  0x1f   : > { %p34_p4 = scmp.ge.s32.totalorder %s32_s28, 2  ;;  %s41_s7 = sadd.s32 1, %s898_s14 }
  0x20   : > { %p48_p6 = scmp.ne.s32.totalorder %s898_s14, %s894_s13  ;;  %p49_p9 = scmp.eq.s32.totalorder %s910_s17, 0 }
  0x21   : > { %s1174_s28 = smov (%p34_p4, %s32_s28), 0  ;;  %p704_p0 = scmp.lt.s32.totalorder %s910_s17, 2 }
  0x22   : > { %p50_p12 = por %p49_p9, %p48_p6  ;;  %p1025_p13 = por %p977_p2, %p48_p6 }
  0x23   : > { %s36_s9 = ssub.s32 %s906_s16, %s1174_s28  ;;  %s164_s10 = sand.u32 1, %s898_s14  }
  0x24   : > { %p39_p3 = scmp.eq.s32.totalorder %s36_s9, 0  ;;  %s680_s11 = smul.u32 36, %s164_s10 }
  0x25   : > { %s681_s19 = smul.u32 576, %s906_s16  ;;  %p1037_p11 = pnand %p704_p0, %p50_p12 }
  0x26   : > { %s1034_s18 = scalar_select %p39_p3, %s898_s14, %s41_s7  }
  0x27   : > { %s168_s25 = scalar_lea.vmem [#allocation2], %s680_s11  ;;  %s175_s5 = scalar_lea.hbm %s1153_s0, %s681_s19 }
  0x28   : > { %s176_s26 = sshll.u32 %s168_s25, 4  ;;  %s165_s6 = scalar_lea.sflag [#allocation3], %s164_s10  ;;  %s177_s26 = int_to_ptr.vmem [resolvable:$true] %s176_s26 }
  0x29   : > { %p800_p2 = pneg %p1037_p11  ;;  %s811_s9 = scalar_lea.vmem %s177_s26, 576 }
  0x2a   : > { %p812_p5 = scmp.ne.s32.totalorder %s177_s26, %s811_s9  ;;  %s915_s7 = smov [#allocation2]  }
  0x2b   : > { %s816_s11 = sshll.u32 %s915_s7, 4  ;;  %s817_s11 = int_to_ptr.vmem [resolvable:$false] %s816_s11 }
  0x2c   : > { %p814_p7 = pnand %p812_p5, %p800_p2  ;;  %s818_s25 = scalar_lea.vmem %s817_s11, 1152 }
  0x2d   : > { %p819_p6 = scmp.lt.s32.totalorder %s177_s26, %s817_s11  ;;  %p820_p9 = scmp.lt.s32.totalorder %s818_s25, %s811_s9 }
  0x2e   : > { %p815_p4 = pneg %p814_p7 }
  0x2f   : > { %p821_p12 = por %p820_p9, %p819_p6 }
  0x31   : > { %p822_p0 = pnand %p821_p12, %p815_p4 }
  0x33   : > { %825 = shalt.err (!%p822_p0)
}
  0x34   : > { %698 = dma.hbm_to_vmem [thread:$0]  (!%p1037_p11), %s175_s5, 576, %s177_s26, %s165_s6, %s913_s30, %s913_s30, %s914_s4  }
  0x35   : > { %188 = sbr.rel (%p993_p8) target bundleno = 295 (0x127), region = 32  ;;  %s1054_s10 = sand.u32 (!%p993_p8), 1, %s894_s13  }
  0x36   : > { %s682_s19 = smul.u32 (!%p993_p8), 36, %s1054_s10  ;;  %s191_s29 = scalar_lea.sflag (!%p993_p8), [#allocation3], %s1054_s10 }
  0x37   : > { %p1166_p3 = scmp.ne.s32.totalorder (!%p993_p8), %s1160_s22, 0 }
  0x38   : > { %s1058_s21 = scalar_lea.vmem (!%p993_p8), [#allocation2], %s682_s19 }
  0x3a   : > { %877 = dma.done.wait (%p1166_p3), %s191_s29, 576  }
  0x3b   : > { %879 = vsyncadd (%p1166_p3), %s191_s29, 4294966720 }
  0x3c   : > { %881 = dma.done.wait (%p973_p1), [#allocation6], 512  }
  0x3d   : > { %883 = vsyncadd (%p973_p1), [#allocation6], 4294966784  ;;  %v760_v0 = vld [vmem:[#allocation5 + $0x18] sm:$0xff]   ;;  %v761_v1 = vld [vmem:[#allocation5 + $0x8] sm:$0xff]   ;;  %vm280_vm0 = vcmask 261120   ;;  %s608_s20 = sshll.u32 %s1054_s10, 6 }
  0x3e   : > { %656 = vmatprep.subr.bf16.mxu0 %v760_v0  ;;  %v762_v2 = vld [vmem:[#allocation5 + $0x10] sm:$0xff]   ;;  %668 = vmatprep.subr.bf16.mxu1 %v761_v1  ;;  %v763_v3 = vld [vmem:[#allocation5] sm:$0xff]   ;;  %v637_v14 = vld [vmem:[%s1155_s2] ss:$0 sm:$0xff]  ;;  %s1088_s30 = scalar_lea.vmem [#allocation7], %s608_s20  ;;  %s643_s26 = sshll.u32 %s902_s15, 10 }
  0x3f   : > { %657 = vmatpush3.bf16.msra.mxu0 %v760_v0  ;;  %669 = vmatpush3.bf16.msra.mxu1 %v761_v1  ;;  %v764_v4 = vld [vmem:[%s1058_s21 + $0x4] sm:$0xff]   ;;  %v766_v6 = vld [vmem:[%s1058_s21 + $0xc] sm:$0xff]   ;;  %v768_v8 = vld [vmem:[%s1058_s21 + $0x14] sm:$0xff]   ;;  %s505_s4 = sshll.u32 %s1088_s30, 4  ;;  %s1103_s6 = scalar_lea.hbm %s1156_s3, %s643_s26  ;;  %s1097_s4 = int_to_ptr.vmem [resolvable:$true] %s505_s4 }
  0x40   : > { %658 = vmatprep.subr.bf16.mxu0 %v762_v2  ;;  %670 = vmatprep.subr.bf16.mxu1 %v763_v3  ;;  %v765_v5 = vld [vmem:[%s1058_s21] sm:$0xff]   ;;  %v767_v7 = vld [vmem:[%s1058_s21 + $0x8] sm:$0xff]   ;;  %v769_v9 = vld [vmem:[%s1058_s21 + $0x10] sm:$0xff]   ;;  %s491_s9 = scalar_lea.sflag [#allocation4], %s1054_s10  ;;  %s826_s7 = scalar_lea.vmem %s1097_s4, 1024 }
  0x41   : > { %660 = vmatprep.mubr.msk.bf16.mxu0 %vm280_vm0, %v764_v4  ;;  %672 = vmatprep.mubr.msk.bf16.mxu1 %vm280_vm0, %v765_v5  ;;  %v770_v10 = vld [vmem:[%s1058_s21 + $0x1c] sm:$0xff]   ;;  %p827_p1 = scmp.ne.s32.totalorder %s1097_s4, %s826_s7  ;;  %s916_s15 = smov [#allocation7]  }
  0x42   : > { %v771_v11 = vld [vmem:[%s1058_s21 + $0x18] sm:$0xff]   ;;  %s830_s11 = sshll.u32 %s916_s15, 4  ;;  %s831_s11 = int_to_ptr.vmem [resolvable:$false] %s830_s11 }
  0x43   : > { %659 = vmatpush3.bf16.msra.mxu0 %v762_v2  ;;  %671 = vmatpush3.bf16.msra.mxu1 %v763_v3  ;;  %p828_p8 = pnand %p827_p1, %p1025_p13  ;;  %s832_s25 = scalar_lea.vmem %s831_s11, 2048 }
  0x44   : > { %p833_p2 = scmp.lt.s32.totalorder %s1097_s4, %s831_s11  ;;  %p834_p5 = scmp.lt.s32.totalorder %s832_s25, %s826_s7 }
  0x45   : > { %p829_p11 = pneg %p828_p8 }
  0x46   : > { %661 = vmatmul.mubr.msk.bf16.vlgmr.msra.gmra.mxu0 %vm280_vm0, %v766_v6  ;;  %673 = vmatmul.mubr.msk.bf16.vlgmr.msra.gmra.mxu1 %vm280_vm0, %v767_v7  ;;  %p835_p7 = por %p834_p5, %p833_p2 }
  0x47   : > { %664 = vmatprep.mubr.msk.bf16.mxu0 %vm280_vm0, %v768_v8  ;;  %676 = vmatprep.mubr.msk.bf16.mxu1 %vm280_vm0, %v769_v9 }
  0x48   : > { %p836_p4 = pnand %p835_p7, %p829_p11 }
  0x4e   : > { %665 = vmatmul.mubr.msk.bf16.gmra.mxu0 %vm280_vm0, %v770_v10  ;;  %677 = vmatmul.mubr.msk.bf16.gmra.mxu1 %vm280_vm0, %v771_v11 }
 0x106   : > { %v662_v12 = vpop.f32.mrf.mxu0  ;;  %v674_v13 = vpop.f32.mrf.mxu1 }
 0x107   : > { %v445_v15 = vadd.f32 %v674_v13, %v662_v12 }
 0x108   : > { %v327_v16 = vpop.f32.mrf.mxu0  ;;  %v436_v17 = vpop.f32.mrf.mxu1 }
 0x109   : > { %v476_v18 = vadd.f32 %v637_v14, %v445_v15  ;;  %v437_v19 = vadd.f32 %v436_v17, %v327_v16 }
 0x10a   : > { %v663_v20 = vpop.f32.mrf.mxu0  ;;  %v675_v21 = vpop.f32.mrf.mxu1 }
 0x10b   : > { %484 = vst [vmem:[%s1088_s30 + $0x10] sm:$0xff] %v476_v18  ;;  %v474_v22 = vadd.f32 %v637_v14, %v437_v19  ;;  %v448_v23 = vadd.f32 %v675_v21, %v663_v20 }
 0x10c   : > { %v330_v24 = vpop.f32.mrf.mxu0  ;;  %v439_v25 = vpop.f32.mrf.mxu1 }
 0x10d   : > { %482 = vst [vmem:[%s1088_s30] sm:$0xff] %v474_v22  ;;  %v477_v26 = vadd.f32 %v637_v14, %v448_v23  ;;  %v440_v27 = vadd.f32 %v439_v25, %v330_v24 }
 0x10e   : > { %v666_v28 = vpop.f32.mrf.mxu0  ;;  %v678_v29 = vpop.f32.mrf.mxu1 }
 0x10f   : > { %485 = vst [vmem:[%s1088_s30 + $0x18] sm:$0xff] %v477_v26  ;;  %v475_v30 = vadd.f32 %v637_v14, %v440_v27  ;;  %v461_v31 = vadd.f32 %v678_v29, %v666_v28 }
 0x110   : > { %v343_v32 = vpop.f32.mrf.mxu0  ;;  %v452_v33 = vpop.f32.mrf.mxu1 }
 0x111   : > { %483 = vst [vmem:[%s1088_s30 + $0x8] sm:$0xff] %v475_v30  ;;  %v480_v34 = vadd.f32 %v637_v14, %v461_v31  ;;  %v453_v35 = vadd.f32 %v452_v33, %v343_v32 }
 0x112   : > { %v667_v36 = vpop.f32.mrf.mxu0  ;;  %v679_v37 = vpop.f32.mrf.mxu1 }
 0x113   : > { %488 = vst [vmem:[%s1088_s30 + $0x30] sm:$0xff] %v480_v34  ;;  %v478_v38 = vadd.f32 %v637_v14, %v453_v35  ;;  %v464_v39 = vadd.f32 %v679_v37, %v667_v36 }
 0x114   : > { %v346_v40 = vpop.f32.mrf.mxu0  ;;  %v455_v41 = vpop.f32.mrf.mxu1 }
 0x115   : > { %486 = vst [vmem:[%s1088_s30 + $0x20] sm:$0xff] %v478_v38  ;;  %v481_v42 = vadd.f32 %v637_v14, %v464_v39  ;;  %v456_v43 = vadd.f32 %v455_v41, %v346_v40 }
 0x117   : > { %489 = vst [vmem:[%s1088_s30 + $0x38] sm:$0xff] %v481_v42  ;;  %v479_v44 = vadd.f32 %v637_v14, %v456_v43 }
 0x119   : > { %487 = vst [vmem:[%s1088_s30 + $0x28] sm:$0xff] %v479_v44 }
 0x11a   : > { %839 = shalt.err (!%p836_p4)
}
 0x11b   : > { %s840_s19 = scalar_lea.hbm %s1103_s6, 1024  ;;  %s844_s20 = scalar_lea.hbm %s1156_s3, 2048 }
 0x11c   : > { %p841_p6 = scmp.ne.s32.totalorder %s1103_s6, %s840_s19  ;;  %p845_p0 = scmp.lt.s32.totalorder %s1103_s6, %s1156_s3 }
 0x11d   : > { %p846_p3 = scmp.lt.s32.totalorder %s844_s20, %s840_s19 }
 0x11e   : > { %p842_p9 = pnand %p841_p6, %p1025_p13 }
 0x11f   : > { %p847_p1 = por %p846_p3, %p845_p0 }
 0x120   : > { %p843_p12 = pneg %p842_p9 }
 0x122   : > { %p848_p8 = pnand %p847_p1, %p843_p12 }
 0x124   : > { %851 = shalt.err (!%p848_p8)
}
 0x125   : > { %s917_s30 = smov 128   ;;  %s918_s26 = smov 8  }
 0x126   : > { %689 = dma.vmem_to_hbm [thread:$0]  (%p1025_p13), %s1097_s4, 1024, %s1103_s6, %s491_s9, %s917_s30, %s917_s30, %s918_s26  }
 0x127 PF: > { %s520_s27 = sand.u32 1, %s890_s12   ;;  %p1167_p11 = scmp.ne.s32.totalorder %s1161_s23, 0 }
 0x128   : > { %s521_s5 = scalar_lea.sflag [#allocation4], %s520_s27 }
 0x129   : > { %p700_p2 = pnand %p604_p10, %p1167_p11 }
 0x12b   : > { %p701_p5 = pneg %p700_p2 }
 0x12d   : > { %885 = dma.done.wait (%p701_p5), %s521_s5, 1024  }
 0x12e   : > { %887 = vsyncadd (%p701_p5), %s521_s5, 4294966272  ;;  %s20_s17 = sadd.s32 1, %s910_s17   ;;  %s1168_s12 = smov %s894_s13 }
 0x12f   : > { %p17_p7 = scmp.ge.s32.totalorder %s20_s17, 4   ;;  %s1169_s13 = smov %s898_s14 }
 0x130   : > { %s1170_s14 = smov %s1034_s18  ;;  %s1171_s15 = smov %s906_s16 }
 0x131   : > { %s1172_s16 = smov %s1174_s28  ;;  %19 = sbr.rel (!%p17_p7) target bundleno = 7 (0x7), region = 83 }
 0x136   :  { %526 = vsyncpa [#allocation3], 1 }
 0x137   :  { %528 = vsyncpa [#allocation3 + $0x1], 1 }
 0x138   :  { %529 = vsyncpa [#allocation6], 1 }
 0x139   :  { %530 = vsyncpa [#allocation4], 1 }
 0x13a   :  { %532 = vsyncpa [#allocation4 + $0x1], 1 }

</bundles_post_ra>
